<compile_context>
chip_gen: v7x
topology: tpu7x:2x2x1
jax: 0.10.0
libtpu: 0.0.40
codegen_flags: <defaults>
</compile_context>

<pallas_src>
import functools
import math

import jax
import jax.numpy as jnp
from jax.experimental import pallas as pl
from jax.experimental.pallas import tpu as pltpu

_LANE = 128
_SUBLANE = 8
# Per-input-buffer VMEM budget; the pipeline double-buffers it, keeping us
# well under the default scoped VMEM limit on all generations (16-32 MiB).
_TILE_BUDGET_BYTES = 4 * 1024 * 1024


def _round_down_multiple(x, m):
    return max(m, (x // m) * m)


# --------------------------------------------------------------------------
# Kernel 1: mean over the last (lane) axis of a [M, K] slab.
# grid = (M tiles [parallel], K tiles [arbitrary, innermost]).
# --------------------------------------------------------------------------
def _mean_lane_kernel(x_ref, o_ref, acc_ref, *, k_total):
    kb = pl.program_id(1)

    @pl.when(kb == 0)
    def _():
        acc_ref[...] = jnp.zeros_like(acc_ref)

    x = x_ref[...].astype(jnp.float32)
    tk = x.shape[-1]

    # Mask the ragged edge of the reduction axis (padded reads are undefined).
    if k_total % tk != 0:
        lane = jax.lax.broadcasted_iota(jnp.int32, x.shape, x.ndim - 1)
        x = jnp.where(lane + kb * tk < k_total, x, 0.0)

    # Tree-sum 128-lane chunks on the VPU first, then one cross-lane XLU pass.
    n_chunks = tk // _LANE
    if n_chunks >= 2 and tk % _LANE == 0:
        part = x[:, :_LANE]
        for c in range(1, n_chunks):
            part = part + x[:, c * _LANE:(c + 1) * _LANE]
        s = jnp.sum(part, axis=-1, keepdims=True)
    else:
        s = jnp.sum(x, axis=-1, keepdims=True)

    acc_ref[...] += s

    @pl.when(kb == pl.num_programs(1) - 1)
    def _():
        o_ref[...] = (acc_ref[...] * (1.0 / k_total)).astype(o_ref.dtype)


def _mean_last_axis(x2d):
    m, k = x2d.shape
    bpe = x2d.dtype.itemsize

    # K (lane) tile: multiple of 128, or the full K.
    tk = k if k <= 2048 else 2048

    # M tile: full M if it fits the budget, else a multiple of 8.
    max_tm = max(1, _TILE_BUDGET_BYTES // (tk * bpe))
    if m <= max_tm:
        tm = m
    else:
        tm = min(_round_down_multiple(max_tm, _SUBLANE), 1024)

    grid = (pl.cdiv(m, tm), pl.cdiv(k, tk))
    kernel = functools.partial(_mean_lane_kernel, k_total=k)
    cost = pl.CostEstimate(
        flops=m * k,
        transcendentals=0,
        bytes_accessed=m * k * bpe + m * bpe,
    )
    return pl.pallas_call(
        kernel,
        out_shape=jax.ShapeDtypeStruct((m, 1), x2d.dtype),
        grid_spec=pltpu.PrefetchScalarGridSpec(
            num_scalar_prefetch=0,
            grid=grid,
            in_specs=[pl.BlockSpec((tm, tk), lambda i, kk: (i, kk))],
            out_specs=pl.BlockSpec((tm, 1), lambda i, kk: (i, 0)),
            scratch_shapes=[pltpu.VMEM((tm, 1), jnp.float32)],
        ),
        compiler_params=pltpu.CompilerParams(
            dimension_semantics=("parallel", "arbitrary"),
        ),
        cost_estimate=cost,
    )(x2d)


# --------------------------------------------------------------------------
# Kernel 2: mean over the middle axis of a [pre, K, post] slab (original
# layout preserved -> no HBM transpose, lane-dense [pre, post] output).
# grid = (pre tiles [parallel], post tiles [parallel], K tiles [arbitrary]).
# --------------------------------------------------------------------------
def _mean_mid_kernel(x_ref, o_ref, acc_ref, *, k_total):
    kb = pl.program_id(2)

    @pl.when(kb == 0)
    def _():
        acc_ref[...] = jnp.zeros_like(acc_ref)

    x = x_ref[...].astype(jnp.float32)
    tk = x.shape[1]

    if k_total % tk != 0:
        kidx = jax.lax.broadcasted_iota(jnp.int32, x.shape, 1)
        x = jnp.where(kidx + kb * tk < k_total, x, 0.0)

    acc_ref[...] += jnp.sum(x, axis=1)

    @pl.when(kb == pl.num_programs(2) - 1)
    def _():
        o_ref[...] = (acc_ref[...] * (1.0 / k_total)).astype(o_ref.dtype)


def _mean_middle_axis(x3d):
    pre, k, post = x3d.shape
    bpe = x3d.dtype.itemsize

    # post (lane) tile: multiple of 128, or the full post extent.
    tq = post if post <= 512 else 512

    # pre tile: full pre when tiny, else a multiple of 8 (output block rule).
    tp = pre if pre <= _SUBLANE else _SUBLANE

    # K tile: full K if it fits, else a multiple of 8 bounded by the budget.
    max_tk = max(1, _TILE_BUDGET_BYTES // (tp * tq * bpe))
    if k <= max_tk:
        tk = k
    else:
        tk = min(_round_down_multiple(max_tk, _SUBLANE), 4096)

    grid = (pl.cdiv(pre, tp), pl.cdiv(post, tq), pl.cdiv(k, tk))
    kernel = functools.partial(_mean_mid_kernel, k_total=k)
    cost = pl.CostEstimate(
        flops=pre * k * post,
        transcendentals=0,
        bytes_accessed=pre * k * post * bpe + pre * post * bpe,
    )
    return pl.pallas_call(
        kernel,
        out_shape=jax.ShapeDtypeStruct((pre, post), x3d.dtype),
        grid_spec=pltpu.PrefetchScalarGridSpec(
            num_scalar_prefetch=0,
            grid=grid,
            in_specs=[pl.BlockSpec((tp, tk, tq), lambda p, q, kk: (p, kk, q))],
            out_specs=pl.BlockSpec((tp, tq), lambda p, q, kk: (p, q)),
            scratch_shapes=[pltpu.VMEM((tp, tq), jnp.float32)],
        ),
        compiler_params=pltpu.CompilerParams(
            dimension_semantics=("parallel", "parallel", "arbitrary"),
        ),
        cost_estimate=cost,
    )(x3d)


class MeanPallas:
    """JAX/Pallas equivalent of the PyTorch `Mean` nn.Module."""

    def __init__(self, dim, keep_dim=False, xla_fallback_elems=0):
        self.dim = dim
        self.keep_dim = keep_dim
        # For tensors with <= this many elements a fused XLA reduce beats a
        # standalone Pallas launch; 0 => always use the Pallas kernel.
        self.xla_fallback_elems = xla_fallback_elems

    def __call__(self, x):
        ndim = x.ndim
        dim = self.dim if self.dim >= 0 else self.dim + ndim
        if not (0 <= dim < ndim):
            raise ValueError(f"dim={self.dim} out of range for ndim={ndim}")

        if x.size <= self.xla_fallback_elems:
            return jnp.mean(x, axis=dim, keepdims=self.keep_dim)

        shape = x.shape
        pre = int(math.prod(shape[:dim]))
        k = int(shape[dim])
        post = int(math.prod(shape[dim + 1:]))
        kept_shape = shape[:dim] + shape[dim + 1:]

        if post == 1:
            # Reduced axis is (effectively) the last one -> lane reduction.
            out = _mean_last_axis(x.reshape(pre, k)).reshape(kept_shape)
        else:
            # Reduce the middle axis in the original layout (no transpose).
            out = _mean_middle_axis(x.reshape(pre, k, post)).reshape(kept_shape)

        if self.keep_dim:
            out = jnp.expand_dims(out, dim)
        return out


if __name__ == "__main__":
    key = jax.random.PRNGKey(0)
    # NCHW input, mirroring the usage in segm_benchmark/layers/encoding.py.
    x = jax.random.normal(key, (2, 4, 16, 16), dtype=jnp.float32)

    # Mean over the last spatial dim (dim=3), keep_dim=False  (lane-axis path).
    out = jax.block_until_ready(MeanPallas(dim=3)(x))
    ref = jnp.mean(x, axis=3)
    assert out.shape == ref.shape, (out.shape, ref.shape)
    assert jnp.allclose(out, ref, atol=1e-5, rtol=1e-5)

    # Mean over channels (dim=1), keep_dim=True  (no-transpose, lane-dense path).
    out2 = jax.block_until_ready(MeanPallas(dim=1, keep_dim=True)(x))
    ref2 = jnp.mean(x, axis=1, keepdims=True)
    assert out2.shape == ref2.shape, (out2.shape, ref2.shape)
    assert jnp.allclose(out2, ref2, atol=1e-5, rtol=1e-5)

    # Moderate shapes that exercise K tiling + accumulator + ragged-edge masking.
    x3 = jax.random.normal(jax.random.PRNGKey(0), (4, 1500, 256), dtype=jnp.float32)
    out3 = jax.block_until_ready(MeanPallas(dim=-2)(x3))
    ref3 = jnp.mean(x3, axis=-2)
    assert out3.shape == ref3.shape
    assert jnp.allclose(out3, ref3, atol=1e-4, rtol=1e-4)

    x4 = jax.random.normal(jax.random.PRNGKey(0), (16, 3000), dtype=jnp.float32)
    out4 = jax.block_until_ready(MeanPallas(dim=1)(x4))
    ref4 = jnp.mean(x4, axis=1)
    assert out4.shape == ref4.shape
    assert jnp.allclose(out4, ref4, atol=1e-4, rtol=1e-4)

    print("KERNEL_OK")
</pallas_src>

<mosaic_0001>
module attributes {stable_mosaic.version = 11 : i64} {
  func.func @_mean_lane_kernel(%arg0: i32, %arg1: i32, %arg2: memref<128x16xf32, #tpu.memory_space<vmem>>, %arg3: memref<128x1xf32, #tpu.memory_space<vmem>>, %arg4: memref<128x1xf32, #tpu.memory_space<vmem>>) attributes {dimension_semantics = [#tpu.dimension_semantics<parallel>, #tpu.dimension_semantics<arbitrary>], iteration_bounds = array<i64: 1, 1>, scalar_prefetch = 0 : i64, scratch_operands = 1 : i64, tpu.core_type = #tpu.core_type<tc>, window_params = [{transform_indices = @transform_0, window_bounds = array<i64: 128, 16>}, {transform_indices = @transform_1, window_bounds = array<i64: 128, 1>}]} {
    %c0_i32 = arith.constant 0 : i32
    %0 = arith.cmpi eq, %arg1, %c0_i32 : i32
    %1 = arith.extui %0 : i1 to i32
    %c0_i32_0 = arith.constant 0 : i32
    %2 = arith.cmpi ne, %1, %c0_i32_0 : i32
    scf.if %2 {
      %cst_8 = arith.constant 0.000000e+00 : f32
      %12 = vector.broadcast %cst_8 : f32 to vector<128x1xf32>
      %c0_9 = arith.constant 0 : index
      %c0_10 = arith.constant 0 : index
      %13 = vector.load %arg4[%c0_9, %c0_10] : memref<128x1xf32, #tpu.memory_space<vmem>>, vector<128x1xf32>
      tpu.vector_store %arg4[%c0_9, %c0_10], %12 {strides = array<i32>} : memref<128x1xf32, #tpu.memory_space<vmem>>, vector<128x1xf32>,
    } else {
    }
    %c0 = arith.constant 0 : index
    %c0_1 = arith.constant 0 : index
    %3 = vector.load %arg2[%c0, %c0_1] : memref<128x16xf32, #tpu.memory_space<vmem>>, vector<128x16xf32>
    %cst = arith.constant dense<0.000000e+00> : vector<128xf32>
    %4 = vector.multi_reduction <add>, %3, %cst [1] : vector<128x16xf32> to vector<128xf32>
    %5 = vector.shape_cast %4 : vector<128xf32> to vector<128x1xf32>
    %c0_2 = arith.constant 0 : index
    %c0_3 = arith.constant 0 : index
    %6 = vector.load %arg4[%c0_2, %c0_3] : memref<128x1xf32, #tpu.memory_space<vmem>>, vector<128x1xf32>
    %7 = arith.addf %6, %5 : vector<128x1xf32>
    %c0_4 = arith.constant 0 : index
    %c0_5 = arith.constant 0 : index
    %8 = vector.load %arg4[%c0_4, %c0_5] : memref<128x1xf32, #tpu.memory_space<vmem>>, vector<128x1xf32>
    tpu.vector_store %arg4[%c0_4, %c0_5], %7 {strides = array<i32>} : memref<128x1xf32, #tpu.memory_space<vmem>>, vector<128x1xf32>,
    %c0_i32_6 = arith.constant 0 : i32
    %9 = arith.cmpi eq, %arg1, %c0_i32_6 : i32
    %10 = arith.extui %9 : i1 to i32
    %c0_i32_7 = arith.constant 0 : i32
    %11 = arith.cmpi ne, %10, %c0_i32_7 : i32
    scf.if %11 {
      %c0_8 = arith.constant 0 : index
      %c0_9 = arith.constant 0 : index
      %12 = vector.load %arg4[%c0_8, %c0_9] : memref<128x1xf32, #tpu.memory_space<vmem>>, vector<128x1xf32>
      %cst_10 = arith.constant 6.250000e-02 : f32
      %13 = vector.broadcast %cst_10 : f32 to vector<128x1xf32>
      %14 = arith.mulf %12, %13 : vector<128x1xf32>
      %c0_11 = arith.constant 0 : index
      %c0_12 = arith.constant 0 : index
      %15 = vector.load %arg3[%c0_11, %c0_12] : memref<128x1xf32, #tpu.memory_space<vmem>>, vector<128x1xf32>
      tpu.vector_store %arg3[%c0_11, %c0_12], %14 {strides = array<i32>} : memref<128x1xf32, #tpu.memory_space<vmem>>, vector<128x1xf32>,
    } else {
    }
    return
  }
  func.func @transform_0(%arg0: i32, %arg1: i32) -> (i32, i32) {
    %c0_i32 = arith.constant 0 : i32
    return %arg0, %arg1 : i32, i32
  }
  func.func @transform_1(%arg0: i32, %arg1: i32) -> (i32, i32) {
    %c0_i32 = arith.constant 0 : i32
    %c0_i32_0 = arith.constant 0 : i32
    return %arg0, %c0_i32 : i32, i32
  }
}

</mosaic_0001>

<bundles_post_ra>
// kernel: tpu_custom_call.1
= control target key start
LH: loop header
LB: loop body
LE: loop exit
PB: predicated region body
PF: predicated region fallthrough
CT: control target
= control target key end

     0   :  { %vm45_vm0 = vcmask 130048   ;;  %vm12_vm1 = vcmask 7168   ;;  %v199_v3 = vmov 0.0   ;;  %s370_s0 = inlined_call_operand.vmem [shape: f32[128,16], index: 0, kind: input, shape index: {}]   ;;  %s371_s1 = inlined_call_operand.vmem [shape: f32[128,1], index: 1, kind: output, shape index: {}]  }
   0x1   :  { %v31_v0 = vld [vmem:[%s370_s0 + $0x10] sm:$0xff]  ;;  %v29_v1 = vld [vmem:[%s370_s0] sm:$0xff]  ;;  %v32_v2 = vld [vmem:[%s370_s0 + $0x18] sm:$0xff]  ;;  %15 = vst.msk [vmem:[#allocation2 + $0x10] sm:$0xff] %vm12_vm1, %v199_v3 }
   0x2   :  { %13 = vst.msk [vmem:[#allocation2] sm:$0xff] %vm12_vm1, %v199_v3  ;;  %14 = vst.msk [vmem:[#allocation2 + $0x8] sm:$0xff] %vm12_vm1, %v199_v3  ;;  %v52_v4 = vsel %vm45_vm0, %v31_v0, 0.0  ;;  %v46_v5 = vsel %vm45_vm0, %v29_v1, 0.0  ;;  %v30_v6 = vld [vmem:[%s370_s0 + $0x8] sm:$0xff]  ;;  %v55_v7 = vsel %vm45_vm0, %v32_v2, 0.0 }
   0x3   :  { %16 = vst.msk [vmem:[#allocation2 + $0x18] sm:$0xff] %vm12_vm1, %v199_v3  ;;  %17 = vst.msk [vmem:[#allocation2 + $0x20] sm:$0xff] %vm12_vm1, %v199_v3  ;;  %53 = vadd.xlane.f32.xlu1 %v52_v4  ;;  %47 = vadd.xlane.f32.xlu0 %v46_v5  ;;  %v49_v8 = vsel %vm45_vm0, %v30_v6, 0.0  ;;  %v34_v9 = vld [vmem:[%s370_s0 + $0x28] sm:$0xff]  ;;  %v33_v10 = vld [vmem:[%s370_s0 + $0x20] sm:$0xff] }
   0x4   :  { %18 = vst.msk [vmem:[#allocation2 + $0x28] sm:$0xff] %vm12_vm1, %v199_v3  ;;  %19 = vst.msk [vmem:[#allocation2 + $0x30] sm:$0xff] %vm12_vm1, %v199_v3  ;;  %v61_v11 = vsel %vm45_vm0, %v34_v9, 0.0  ;;  %v58_v12 = vsel %vm45_vm0, %v33_v10, 0.0  ;;  %v36_v13 = vld [vmem:[%s370_s0 + $0x38] sm:$0xff]  ;;  %v35_v14 = vld [vmem:[%s370_s0 + $0x30] sm:$0xff] }
   0x5   :  { %20 = vst.msk [vmem:[#allocation2 + $0x38] sm:$0xff] %vm12_vm1, %v199_v3  ;;  %21 = vst.msk [vmem:[#allocation2 + $0x40] sm:$0xff] %vm12_vm1, %v199_v3  ;;  %v67_v15 = vsel %vm45_vm0, %v36_v13, 0.0  ;;  %v64_v16 = vsel %vm45_vm0, %v35_v14, 0.0  ;;  %v38_v17 = vld [vmem:[%s370_s0 + $0x48] sm:$0xff]  ;;  %v37_v18 = vld [vmem:[%s370_s0 + $0x40] sm:$0xff] }
   0x6   :  { %22 = vst.msk [vmem:[#allocation2 + $0x48] sm:$0xff] %vm12_vm1, %v199_v3  ;;  %23 = vst.msk [vmem:[#allocation2 + $0x50] sm:$0xff] %vm12_vm1, %v199_v3  ;;  %v73_v19 = vsel %vm45_vm0, %v38_v17, 0.0  ;;  %v70_v20 = vsel %vm45_vm0, %v37_v18, 0.0  ;;  %v40_v21 = vld [vmem:[%s370_s0 + $0x58] sm:$0xff]  ;;  %v39_v22 = vld [vmem:[%s370_s0 + $0x50] sm:$0xff] }
   0x7   :  { %24 = vst.msk [vmem:[#allocation2 + $0x58] sm:$0xff] %vm12_vm1, %v199_v3  ;;  %25 = vst.msk [vmem:[#allocation2 + $0x60] sm:$0xff] %vm12_vm1, %v199_v3  ;;  %56 = vadd.xlane.f32.xlu1 %v55_v7  ;;  %50 = vadd.xlane.f32.xlu0 %v49_v8  ;;  %v79_v23 = vsel %vm45_vm0, %v40_v21, 0.0  ;;  %v76_v24 = vsel %vm45_vm0, %v39_v22, 0.0  ;;  %v42_v25 = vld [vmem:[%s370_s0 + $0x68] sm:$0xff]  ;;  %v41_v26 = vld [vmem:[%s370_s0 + $0x60] sm:$0xff] }
   0x8   :  { %26 = vst.msk [vmem:[#allocation2 + $0x68] sm:$0xff] %vm12_vm1, %v199_v3  ;;  %27 = vst.msk [vmem:[#allocation2 + $0x70] sm:$0xff] %vm12_vm1, %v199_v3  ;;  %v85_v27 = vsel %vm45_vm0, %v42_v25, 0.0  ;;  %v82_v28 = vsel %vm45_vm0, %v41_v26, 0.0  ;;  %v44_v29 = vld [vmem:[%s370_s0 + $0x78] sm:$0xff]  ;;  %v43_v30 = vld [vmem:[%s370_s0 + $0x70] sm:$0xff] }
   0x9   :  { %28 = vst.msk [vmem:[#allocation2 + $0x78] sm:$0xff] %vm12_vm1, %v199_v3  ;;  %v91_v31 = vsel %vm45_vm0, %v44_v29, 0.0  ;;  %v88_v32 = vsel %vm45_vm0, %v43_v30, 0.0  ;;  %v96_v33 = vld [vmem:[#allocation2 + $0x10] sm:$0xff]  ;;  %v94_v34 = vld [vmem:[#allocation2] sm:$0xff]  ;;  %v95_v40 = vld [vmem:[#allocation2 + $0x8] sm:$0xff] }
   0xa   :  { %v97_v39 = vld [vmem:[#allocation2 + $0x18] sm:$0xff]  ;;  %v98_v46 = vld [vmem:[#allocation2 + $0x20] sm:$0xff] }
   0xb   :  { %62 = vadd.xlane.f32.xlu1 %v61_v11  ;;  %59 = vadd.xlane.f32.xlu0 %v58_v12  ;;  %v99_v45 = vld [vmem:[#allocation2 + $0x28] sm:$0xff]  ;;  %v100_v54 = vld [vmem:[#allocation2 + $0x30] sm:$0xff] }
   0xc   :  { %v101_v51 = vld [vmem:[#allocation2 + $0x38] sm:$0xff]  ;;  %v102_v0 = vld [vmem:[#allocation2 + $0x40] sm:$0xff] }
   0xd   :  { %v103_v61 = vld [vmem:[#allocation2 + $0x48] sm:$0xff]  ;;  %v104_v10 = vld [vmem:[#allocation2 + $0x50] sm:$0xff] }
   0xe   :  { %v105_v7 = vld [vmem:[#allocation2 + $0x58] sm:$0xff] }
   0xf   :  { %68 = vadd.xlane.f32.xlu1 %v67_v15  ;;  %65 = vadd.xlane.f32.xlu0 %v64_v16  ;;  %v107_v17 = vld [vmem:[#allocation2 + $0x68] sm:$0xff]  ;;  %v108_v30 = vld [vmem:[#allocation2 + $0x70] sm:$0xff] }
  0x13   :  { %74 = vadd.xlane.f32.xlu1 %v73_v19  ;;  %71 = vadd.xlane.f32.xlu0 %v70_v20  ;;  %v106_v20 = vld [vmem:[#allocation2 + $0x60] sm:$0xff] }
  0x17   :  { %80 = vadd.xlane.f32.xlu1 %v79_v23  ;;  %77 = vadd.xlane.f32.xlu0 %v76_v24 }
  0x1b   :  { %86 = vadd.xlane.f32.xlu1 %v85_v27  ;;  %83 = vadd.xlane.f32.xlu0 %v82_v28  ;;  %v109_v27 = vld [vmem:[#allocation2 + $0x78] sm:$0xff] }
  0x1f   :  { %92 = vadd.xlane.f32.xlu1 %v91_v31  ;;  %89 = vadd.xlane.f32.xlu0 %v88_v32 }
  0x90   :  { %v54_v35 = vpop.xlane.xlu1 %53  ;;  %v48_v36 = vpop.xlane.xlu0 %47 }
  0x91   :  { %v112_v37 = vadd.f32 %v96_v33, %v54_v35  ;;  %v110_v38 = vadd.f32 %v94_v34, %v48_v36 }
  0x93   :  { %129 = vst.msk [vmem:[#allocation2 + $0x10] sm:$0xff] %vm12_vm1, %v112_v37  ;;  %127 = vst.msk [vmem:[#allocation2] sm:$0xff] %vm12_vm1, %v110_v38 }
  0x94   :  { %v57_v41 = vpop.xlane.xlu1 %56  ;;  %v51_v42 = vpop.xlane.xlu0 %50 }
  0x95   :  { %v113_v43 = vadd.f32 %v97_v39, %v57_v41  ;;  %v111_v44 = vadd.f32 %v95_v40, %v51_v42 }
  0x97   :  { %130 = vst.msk [vmem:[#allocation2 + $0x18] sm:$0xff] %vm12_vm1, %v113_v43  ;;  %128 = vst.msk [vmem:[#allocation2 + $0x8] sm:$0xff] %vm12_vm1, %v111_v44 }
  0x98   :  { %v63_v47 = vpop.xlane.xlu1 %62  ;;  %v60_v48 = vpop.xlane.xlu0 %59 }
  0x99   :  { %v115_v49 = vadd.f32 %v99_v45, %v63_v47  ;;  %v114_v50 = vadd.f32 %v98_v46, %v60_v48 }
  0x9a   :  { %v148_v52 = vld [vmem:[#allocation2 + $0x10] sm:$0xff]  ;;  %v146_v53 = vld [vmem:[#allocation2] sm:$0xff] }
  0x9b   :  { %v164_v55 = vmul.f32 0.0625, %v148_v52  ;;  %v162_v56 = vmul.f32 0.0625, %v146_v53  ;;  %132 = vst.msk [vmem:[#allocation2 + $0x28] sm:$0xff] %vm12_vm1, %v115_v49  ;;  %131 = vst.msk [vmem:[#allocation2 + $0x20] sm:$0xff] %vm12_vm1, %v114_v50 }
  0x9c   :  { %v69_v57 = vpop.xlane.xlu1 %68  ;;  %v66_v58 = vpop.xlane.xlu0 %65 }
  0x9d   :  { %180 = vst.msk [vmem:[%s371_s1 + $0x10] sm:$0xff] %vm12_vm1, %v164_v55  ;;  %178 = vst.msk [vmem:[%s371_s1] sm:$0xff] %vm12_vm1, %v162_v56  ;;  %v117_v59 = vadd.f32 %v101_v51, %v69_v57  ;;  %v116_v60 = vadd.f32 %v100_v54, %v66_v58 }
  0x9e   :  { %v149_v62 = vld [vmem:[#allocation2 + $0x18] sm:$0xff]  ;;  %v147_v63 = vld [vmem:[#allocation2 + $0x8] sm:$0xff] }
  0x9f   :  { %v165_v1 = vmul.f32 0.0625, %v149_v62  ;;  %v163_v2 = vmul.f32 0.0625, %v147_v63  ;;  %134 = vst.msk [vmem:[#allocation2 + $0x38] sm:$0xff] %vm12_vm1, %v117_v59  ;;  %133 = vst.msk [vmem:[#allocation2 + $0x30] sm:$0xff] %vm12_vm1, %v116_v60 }
  0xa0   :  { %v75_v3 = vpop.xlane.xlu1 %74  ;;  %v72_v4 = vpop.xlane.xlu0 %71 }
  0xa1   :  { %181 = vst.msk [vmem:[%s371_s1 + $0x18] sm:$0xff] %vm12_vm1, %v165_v1  ;;  %179 = vst.msk [vmem:[%s371_s1 + $0x8] sm:$0xff] %vm12_vm1, %v163_v2  ;;  %v119_v5 = vadd.f32 %v103_v61, %v75_v3  ;;  %v118_v6 = vadd.f32 %v102_v0, %v72_v4 }
  0xa2   :  { %v151_v8 = vld [vmem:[#allocation2 + $0x28] sm:$0xff]  ;;  %v150_v9 = vld [vmem:[#allocation2 + $0x20] sm:$0xff] }
  0xa3   :  { %v167_v11 = vmul.f32 0.0625, %v151_v8  ;;  %v166_v12 = vmul.f32 0.0625, %v150_v9  ;;  %136 = vst.msk [vmem:[#allocation2 + $0x48] sm:$0xff] %vm12_vm1, %v119_v5  ;;  %135 = vst.msk [vmem:[#allocation2 + $0x40] sm:$0xff] %vm12_vm1, %v118_v6 }
  0xa4   :  { %v81_v13 = vpop.xlane.xlu1 %80  ;;  %v78_v14 = vpop.xlane.xlu0 %77 }
  0xa5   :  { %183 = vst.msk [vmem:[%s371_s1 + $0x28] sm:$0xff] %vm12_vm1, %v167_v11  ;;  %182 = vst.msk [vmem:[%s371_s1 + $0x20] sm:$0xff] %vm12_vm1, %v166_v12  ;;  %v121_v15 = vadd.f32 %v105_v7, %v81_v13  ;;  %v120_v16 = vadd.f32 %v104_v10, %v78_v14 }
  0xa6   :  { %v153_v18 = vld [vmem:[#allocation2 + $0x38] sm:$0xff]  ;;  %v152_v19 = vld [vmem:[#allocation2 + $0x30] sm:$0xff] }
  0xa7   :  { %v169_v21 = vmul.f32 0.0625, %v153_v18  ;;  %v168_v22 = vmul.f32 0.0625, %v152_v19  ;;  %138 = vst.msk [vmem:[#allocation2 + $0x58] sm:$0xff] %vm12_vm1, %v121_v15  ;;  %137 = vst.msk [vmem:[#allocation2 + $0x50] sm:$0xff] %vm12_vm1, %v120_v16 }
  0xa8   :  { %v87_v23 = vpop.xlane.xlu1 %86  ;;  %v84_v24 = vpop.xlane.xlu0 %83 }
  0xa9   :  { %185 = vst.msk [vmem:[%s371_s1 + $0x38] sm:$0xff] %vm12_vm1, %v169_v21  ;;  %184 = vst.msk [vmem:[%s371_s1 + $0x30] sm:$0xff] %vm12_vm1, %v168_v22  ;;  %v123_v25 = vadd.f32 %v107_v17, %v87_v23  ;;  %v122_v26 = vadd.f32 %v106_v20, %v84_v24 }
  0xaa   :  { %v155_v28 = vld [vmem:[#allocation2 + $0x48] sm:$0xff]  ;;  %v154_v29 = vld [vmem:[#allocation2 + $0x40] sm:$0xff] }
  0xab   :  { %v171_v31 = vmul.f32 0.0625, %v155_v28  ;;  %v170_v32 = vmul.f32 0.0625, %v154_v29  ;;  %140 = vst.msk [vmem:[#allocation2 + $0x68] sm:$0xff] %vm12_vm1, %v123_v25  ;;  %139 = vst.msk [vmem:[#allocation2 + $0x60] sm:$0xff] %vm12_vm1, %v122_v26 }
  0xac   :  { %v93_v33 = vpop.xlane.xlu1 %92  ;;  %v90_v34 = vpop.xlane.xlu0 %89 }
  0xad   :  { %187 = vst.msk [vmem:[%s371_s1 + $0x48] sm:$0xff] %vm12_vm1, %v171_v31  ;;  %186 = vst.msk [vmem:[%s371_s1 + $0x40] sm:$0xff] %vm12_vm1, %v170_v32  ;;  %v125_v35 = vadd.f32 %v109_v27, %v93_v33  ;;  %v124_v36 = vadd.f32 %v108_v30, %v90_v34 }
  0xae   :  { %v157_v37 = vld [vmem:[#allocation2 + $0x58] sm:$0xff]  ;;  %v156_v38 = vld [vmem:[#allocation2 + $0x50] sm:$0xff] }
  0xaf   :  { %v173_v39 = vmul.f32 0.0625, %v157_v37  ;;  %v172_v40 = vmul.f32 0.0625, %v156_v38  ;;  %142 = vst.msk [vmem:[#allocation2 + $0x78] sm:$0xff] %vm12_vm1, %v125_v35  ;;  %141 = vst.msk [vmem:[#allocation2 + $0x70] sm:$0xff] %vm12_vm1, %v124_v36 }
  0xb1   :  { %189 = vst.msk [vmem:[%s371_s1 + $0x58] sm:$0xff] %vm12_vm1, %v173_v39  ;;  %188 = vst.msk [vmem:[%s371_s1 + $0x50] sm:$0xff] %vm12_vm1, %v172_v40 }
  0xb2   :  { %v159_v41 = vld [vmem:[#allocation2 + $0x68] sm:$0xff]  ;;  %v158_v42 = vld [vmem:[#allocation2 + $0x60] sm:$0xff] }
  0xb3   :  { %v175_v43 = vmul.f32 0.0625, %v159_v41  ;;  %v174_v44 = vmul.f32 0.0625, %v158_v42 }
  0xb5   :  { %191 = vst.msk [vmem:[%s371_s1 + $0x68] sm:$0xff] %vm12_vm1, %v175_v43  ;;  %190 = vst.msk [vmem:[%s371_s1 + $0x60] sm:$0xff] %vm12_vm1, %v174_v44 }
  0xb6   :  { %v161_v45 = vld [vmem:[#allocation2 + $0x78] sm:$0xff]  ;;  %v160_v46 = vld [vmem:[#allocation2 + $0x70] sm:$0xff] }
  0xb7   :  { %v177_v47 = vmul.f32 0.0625, %v161_v45  ;;  %v176_v48 = vmul.f32 0.0625, %v160_v46 }
  0xb9   :  { %193 = vst.msk [vmem:[%s371_s1 + $0x78] sm:$0xff] %vm12_vm1, %v177_v47  ;;  %192 = vst.msk [vmem:[%s371_s1 + $0x70] sm:$0xff] %vm12_vm1, %v176_v48 }

</bundles_post_ra>
